<compile_context>
chip_gen: v7x
topology: tpu7x:2x2x1
jax: 0.10.0
libtpu: 0.0.40
codegen_flags: <defaults>
</compile_context>

<pallas_src>
import jax
import jax.numpy as jnp
import numpy as np
from jax.experimental import pallas as pl
from jax.experimental.pallas import tpu as pltpu

HIDDEN_SIZE = 64
INPUT_SIZE = 1
N_STEPS = 12
NUM_CLASSES = 1
NUM_LAYERS = 1


def lstm_kernel(x_ref, hc0_ref, whh_ref, p_ref, out_ref, gx_ref):
    """Single-invocation LSTM forward + FC head.

    x_ref:   (T*Bp, 1)   time-major flattened input, batch padded to Bp
    hc0_ref: (2*Bp, H)   rows [0:Bp] = h0, rows [Bp:2Bp] = c0
    whh_ref: (H, 4H)     bf16, gate blocks [i,f,o,g], i/f/o cols pre-scaled 0.5
    p_ref:   (3, 4H)     f32; row0 = w_ih row (scaled), row1 = b_ih+b_hh
                         (scaled), row2 = [w_fc (H lanes) | b_fc | zeros]
    out_ref: (Bp, 1)
    gx_ref:  (T*Bp, 4H)  f32 VMEM scratch for the precomputed input gates
    """
    Bp = hc0_ref.shape[0] // 2
    H = hc0_ref.shape[1]
    T = x_ref.shape[0] // Bp  # static

    # Input projection for ALL timesteps at once.  input_size == 1, so this is
    # a VPU broadcast multiply (no MXU push).  Parked in VMEM scratch so it is
    # not a live vreg value across the unrolled recurrence.
    gx_ref[...] = x_ref[...] * p_ref[0:1, :] + p_ref[1:2, :]

    whh = whh_ref[...]                     # (H, 4H) bf16, ~8 vregs live
    h = hc0_ref[0:Bp, :]                   # (Bp, H) f32
    c = hc0_ref[Bp:2 * Bp, :]              # (Bp, H) f32

    # Fully unrolled recurrence over the small static sequence length.
    # bf16 MXU inputs, f32 accumulation; state math stays f32.
    for t in range(T):
        gates = gx_ref[t * Bp:(t + 1) * Bp, :] + jnp.dot(
            h.astype(jnp.bfloat16), whh, preferred_element_type=jnp.float32)
        tg = jnp.tanh(gates)               # one wide EUP push over all 4H
        sig = 0.5 * tg[:, :3 * H] + 0.5    # sigmoid(x) = 0.5*tanh(x/2)+0.5
        i_g = sig[:, 0:H]
        f_g = sig[:, H:2 * H]
        o_g = sig[:, 2 * H:3 * H]
        g_g = tg[:, 3 * H:]
        c = f_g * c + i_g * g_g
        h = o_g * jnp.tanh(c)

    # FC head (num_classes == 1): VPU mul + cross-lane reduction, no MXU.
    wfc = p_ref[2:3, 0:H]                  # (1, H)
    bfc = p_ref[2:3, H:H + 1]              # (1, 1)
    out_ref[...] = jnp.sum(h * wfc, axis=-1, keepdims=True) + bfc


def prepare_lstm_params(w_ih, w_hh, b_ih, b_hh, w_fc, b_fc):
    """One-time weight preprocessing (hoist out of the hot path when weights
    are fixed across calls).  Returns (whh_bf16 (H,4H), packed (3,4H) f32)."""
    f32 = jnp.float32
    H = w_hh.shape[1]
    I = w_ih.shape[1]
    C = w_fc.shape[0]
    assert I == 1 and C == 1, "kernel specializes input_size=1, num_classes=1"

    def reorder(w):  # PyTorch gate blocks [i,f,g,o] -> [i,f,o,g] along axis 0
        blocks = jnp.asarray(w, f32).reshape(4, H, *w.shape[1:])
        return blocks[jnp.array([0, 1, 3, 2])].reshape(w.shape)

    # Pre-scale i/f/o gate rows by 0.5 (exact) for the tanh-only sigmoid.
    scale = jnp.concatenate([jnp.full((3 * H,), 0.5, f32),
                             jnp.ones((H,), f32)])

    wih_row = reorder(w_ih)[:, 0] * scale                            # (4H,)
    bias = reorder(jnp.asarray(b_ih, f32) + jnp.asarray(b_hh, f32)) * scale
    whh_bf16 = (reorder(w_hh) * scale[:, None]).T.astype(jnp.bfloat16)  # (H,4H)

    row2 = jnp.zeros((4 * H,), f32)
    row2 = row2.at[:H].set(jnp.asarray(w_fc, f32).reshape(H))
    row2 = row2.at[H].set(jnp.asarray(b_fc, f32)[0])
    packed = jnp.stack([wih_row, bias, row2], axis=0)                # (3, 4H)
    return whh_bf16, packed


def lstm_predict_prepared(x, h0, c0, params):
    """x: (B, T, 1); h0/c0: (B, H); params from prepare_lstm_params.
    Returns (B, 1)."""
    whh_bf16, packed = params
    B, T, I = x.shape
    H = h0.shape[-1]
    assert I == 1
    Bp = max(8, -(-B // 8) * 8)            # pad batch to a multiple of 8

    # Time-major + batch padding, flattened for the one-shot input projection.
    x_tm = jnp.transpose(x, (1, 0, 2)).astype(jnp.float32)           # (T, B, 1)
    x_tm = jnp.pad(x_tm, ((0, 0), (0, Bp - B), (0, 0)))
    x_flat = x_tm.reshape(T * Bp, 1)

    h0p = jnp.pad(jnp.asarray(h0, jnp.float32), ((0, Bp - B), (0, 0)))
    c0p = jnp.pad(jnp.asarray(c0, jnp.float32), ((0, Bp - B), (0, 0)))
    hc0 = jnp.concatenate([h0p, c0p], axis=0)                        # (2Bp, H)

    vmem = pltpu.MemorySpace.VMEM
    out = pl.pallas_call(
        lstm_kernel,
        out_shape=jax.ShapeDtypeStruct((Bp, 1), jnp.float32),
        in_specs=[pl.BlockSpec(memory_space=vmem)] * 4,
        out_specs=pl.BlockSpec(memory_space=vmem),
        scratch_shapes=[pltpu.VMEM((T * Bp, 4 * H), jnp.float32)],
    )(x_flat, hc0, whh_bf16, packed)
    return out[:B]


def lstm_predict(x, h0, c0, w_ih, w_hh, b_ih, b_hh, w_fc, b_fc):
    return lstm_predict_prepared(
        x, h0, c0, prepare_lstm_params(w_ih, w_hh, b_ih, b_hh, w_fc, b_fc))


def lstm_predict_ref(x, h0, c0, w_ih, w_hh, b_ih, b_hh, w_fc, b_fc):
    """Pure-JAX f32 reference (PyTorch LSTM semantics, gate order i,f,g,o)."""
    H = h0.shape[-1]
    h, c = h0, c0
    for t in range(x.shape[1]):
        x_t = x[:, t, :]
        gates = x_t @ w_ih.T + h @ w_hh.T + b_ih + b_hh
        i = jax.nn.sigmoid(gates[:, 0:H])
        f = jax.nn.sigmoid(gates[:, H:2 * H])
        g = jnp.tanh(gates[:, 2 * H:3 * H])
        o = jax.nn.sigmoid(gates[:, 3 * H:4 * H])
        c = f * c + i * g
        h = o * jnp.tanh(c)
    return h @ w_fc.T + b_fc


if __name__ == "__main__":
    B = 2
    key = jax.random.PRNGKey(0)
    ks = jax.random.split(key, 8)

    # Deterministic parameter init (PyTorch nn.LSTM default: U(-k, k), k=1/sqrt(H)).
    k = 1.0 / np.sqrt(HIDDEN_SIZE)
    w_ih = jax.random.uniform(ks[0], (4 * HIDDEN_SIZE, INPUT_SIZE), jnp.float32, -k, k)
    w_hh = jax.random.uniform(ks[1], (4 * HIDDEN_SIZE, HIDDEN_SIZE), jnp.float32, -k, k)
    b_ih = jax.random.uniform(ks[2], (4 * HIDDEN_SIZE,), jnp.float32, -k, k)
    b_hh = jax.random.uniform(ks[3], (4 * HIDDEN_SIZE,), jnp.float32, -k, k)
    w_fc = jax.random.uniform(ks[4], (NUM_CLASSES, HIDDEN_SIZE), jnp.float32, -k, k)
    b_fc = jax.random.uniform(ks[5], (NUM_CLASSES,), jnp.float32, -k, k)

    # h_0 / c_0: the PyTorch forward draws xavier_normal_ tensors each call;
    # here they are deterministic kernel inputs with the same distribution.
    xav_std = np.sqrt(2.0 / (B * HIDDEN_SIZE + NUM_LAYERS * HIDDEN_SIZE))
    h0 = (jax.random.normal(ks[6], (NUM_LAYERS, B, HIDDEN_SIZE), jnp.float32) * xav_std)[0]
    c0 = (jax.random.normal(ks[7], (NUM_LAYERS, B, HIDDEN_SIZE), jnp.float32) * xav_std)[0]

    # Input: (batch, n_steps, input_size)
    x = jax.random.normal(jax.random.PRNGKey(42), (B, N_STEPS, INPUT_SIZE), jnp.float32)

    predict = jax.jit(lstm_predict)
    out = predict(x, h0, c0, w_ih, w_hh, b_ih, b_hh, w_fc, b_fc)
    out = jax.block_until_ready(out)

    ref = lstm_predict_ref(x, h0, c0, w_ih, w_hh, b_ih, b_hh, w_fc, b_fc)
    # Tolerance loosened vs. the pure-f32 version: the recurrence matmul now
    # uses bf16 MXU inputs (f32 accumulation).
    np.testing.assert_allclose(np.asarray(out), np.asarray(ref), rtol=2e-2, atol=2e-2)

    print("KERNEL_OK")
</pallas_src>

<mosaic_0001>
module attributes {stable_mosaic.version = 11 : i64} {
  func.func @lstm_kernel(%arg0: memref<96x1xf32, #tpu.memory_space<vmem>>, %arg1: memref<16x64xf32, #tpu.memory_space<vmem>>, %arg2: memref<64x256xbf16, #tpu.memory_space<vmem>>, %arg3: memref<3x256xf32, #tpu.memory_space<vmem>>, %arg4: memref<8x1xf32, #tpu.memory_space<vmem>>, %arg5: memref<96x256xf32, #tpu.memory_space<vmem>>) attributes {dimension_semantics = [], scalar_prefetch = 0 : i64, scratch_operands = 1 : i64, tpu.core_type = #tpu.core_type<tc>} {
    %c0 = arith.constant 0 : index
    %c0_0 = arith.constant 0 : index
    %0 = vector.load %arg0[%c0, %c0_0] : memref<96x1xf32, #tpu.memory_space<vmem>>, vector<96x1xf32>
    %c0_1 = arith.constant 0 : index
    %c0_2 = arith.constant 0 : index
    %1 = vector.load %arg3[%c0_1, %c0_2] : memref<3x256xf32, #tpu.memory_space<vmem>>, vector<1x256xf32>
    %2 = vector.broadcast %0 : vector<96x1xf32> to vector<96x256xf32>
    %3 = vector.broadcast %1 : vector<1x256xf32> to vector<96x256xf32>
    %4 = arith.mulf %2, %3 : vector<96x256xf32>
    %c1 = arith.constant 1 : index
    %c0_3 = arith.constant 0 : index
    %5 = vector.load %arg3[%c1, %c0_3] : memref<3x256xf32, #tpu.memory_space<vmem>>, vector<1x256xf32>
    %6 = vector.broadcast %5 : vector<1x256xf32> to vector<96x256xf32>
    %7 = arith.addf %4, %6 : vector<96x256xf32>
    %c0_4 = arith.constant 0 : index
    %c0_5 = arith.constant 0 : index
    %8 = vector.load %arg5[%c0_4, %c0_5] : memref<96x256xf32, #tpu.memory_space<vmem>>, vector<96x256xf32>
    tpu.vector_store %arg5[%c0_4, %c0_5], %7 {strides = array<i32>} : memref<96x256xf32, #tpu.memory_space<vmem>>, vector<96x256xf32>,
    %c0_6 = arith.constant 0 : index
    %c0_7 = arith.constant 0 : index
    %9 = vector.load %arg2[%c0_6, %c0_7] : memref<64x256xbf16, #tpu.memory_space<vmem>>, vector<64x256xbf16>
    %c0_8 = arith.constant 0 : index
    %c0_9 = arith.constant 0 : index
    %10 = vector.load %arg1[%c0_8, %c0_9] : memref<16x64xf32, #tpu.memory_space<vmem>>, vector<8x64xf32>
    %c8 = arith.constant 8 : index
    %c0_10 = arith.constant 0 : index
    %11 = vector.load %arg1[%c8, %c0_10] : memref<16x64xf32, #tpu.memory_space<vmem>>, vector<8x64xf32>
    %c0_11 = arith.constant 0 : index
    %c0_12 = arith.constant 0 : index
    %12 = vector.load %arg5[%c0_11, %c0_12] : memref<96x256xf32, #tpu.memory_space<vmem>>, vector<8x256xf32>
    %13 = arith.truncf %10 : vector<8x64xf32> to vector<8x64xbf16>
    %cst = arith.constant dense<0.000000e+00> : vector<8x256xf32>
    %14 = tpu.matmul %13, %9, %cst {dimension_numbers = #tpu.dot_dimension_numbers<[1], [0], [0], [1], [0, 0, 1, 1], [], []>} : vector<8x64xbf16>, vector<64x256xbf16>, vector<8x256xf32> -> vector<8x256xf32>
    %15 = arith.addf %12, %14 : vector<8x256xf32>
    %16 = math.tanh %15 : vector<8x256xf32>
    %17 = vector.extract_strided_slice %16 {offsets = [0, 0], sizes = [8, 192], strides = [1, 1]} : vector<8x256xf32> to vector<8x192xf32>
    %cst_13 = arith.constant 5.000000e-01 : f32
    %18 = vector.broadcast %cst_13 : f32 to vector<8x192xf32>
    %19 = arith.mulf %18, %17 : vector<8x192xf32>
    %cst_14 = arith.constant 5.000000e-01 : f32
    %20 = vector.broadcast %cst_14 : f32 to vector<8x192xf32>
    %21 = arith.addf %19, %20 : vector<8x192xf32>
    %22 = vector.extract_strided_slice %21 {offsets = [0, 0], sizes = [8, 64], strides = [1, 1]} : vector<8x192xf32> to vector<8x64xf32>
    %23 = vector.extract_strided_slice %21 {offsets = [0, 64], sizes = [8, 64], strides = [1, 1]} : vector<8x192xf32> to vector<8x64xf32>
    %24 = vector.extract_strided_slice %21 {offsets = [0, 128], sizes = [8, 64], strides = [1, 1]} : vector<8x192xf32> to vector<8x64xf32>
    %25 = vector.extract_strided_slice %16 {offsets = [0, 192], sizes = [8, 64], strides = [1, 1]} : vector<8x256xf32> to vector<8x64xf32>
    %26 = arith.mulf %23, %11 : vector<8x64xf32>
    %27 = arith.mulf %22, %25 : vector<8x64xf32>
    %28 = arith.addf %26, %27 : vector<8x64xf32>
    %29 = math.tanh %28 : vector<8x64xf32>
    %30 = arith.mulf %24, %29 : vector<8x64xf32>
    %c8_15 = arith.constant 8 : index
    %c0_16 = arith.constant 0 : index
    %31 = vector.load %arg5[%c8_15, %c0_16] : memref<96x256xf32, #tpu.memory_space<vmem>>, vector<8x256xf32>
    %32 = arith.truncf %30 : vector<8x64xf32> to vector<8x64xbf16>
    %cst_17 = arith.constant dense<0.000000e+00> : vector<8x256xf32>
    %33 = tpu.matmul %32, %9, %cst_17 {dimension_numbers = #tpu.dot_dimension_numbers<[1], [0], [0], [1], [0, 0, 1, 1], [], []>} : vector<8x64xbf16>, vector<64x256xbf16>, vector<8x256xf32> -> vector<8x256xf32>
    %34 = arith.addf %31, %33 : vector<8x256xf32>
    %35 = math.tanh %34 : vector<8x256xf32>
    %36 = vector.extract_strided_slice %35 {offsets = [0, 0], sizes = [8, 192], strides = [1, 1]} : vector<8x256xf32> to vector<8x192xf32>
    %cst_18 = arith.constant 5.000000e-01 : f32
    %37 = vector.broadcast %cst_18 : f32 to vector<8x192xf32>
    %38 = arith.mulf %37, %36 : vector<8x192xf32>
    %cst_19 = arith.constant 5.000000e-01 : f32
    %39 = vector.broadcast %cst_19 : f32 to vector<8x192xf32>
    %40 = arith.addf %38, %39 : vector<8x192xf32>
    %41 = vector.extract_strided_slice %40 {offsets = [0, 0], sizes = [8, 64], strides = [1, 1]} : vector<8x192xf32> to vector<8x64xf32>
    %42 = vector.extract_strided_slice %40 {offsets = [0, 64], sizes = [8, 64], strides = [1, 1]} : vector<8x192xf32> to vector<8x64xf32>
    %43 = vector.extract_strided_slice %40 {offsets = [0, 128], sizes = [8, 64], strides = [1, 1]} : vector<8x192xf32> to vector<8x64xf32>
    %44 = vector.extract_strided_slice %35 {offsets = [0, 192], sizes = [8, 64], strides = [1, 1]} : vector<8x256xf32> to vector<8x64xf32>
    %45 = arith.mulf %42, %28 : vector<8x64xf32>
    %46 = arith.mulf %41, %44 : vector<8x64xf32>
    %47 = arith.addf %45, %46 : vector<8x64xf32>
    %48 = math.tanh %47 : vector<8x64xf32>
    %49 = arith.mulf %43, %48 : vector<8x64xf32>
    %c16 = arith.constant 16 : index
    %c0_20 = arith.constant 0 : index
    %50 = vector.load %arg5[%c16, %c0_20] : memref<96x256xf32, #tpu.memory_space<vmem>>, vector<8x256xf32>
    %51 = arith.truncf %49 : vector<8x64xf32> to vector<8x64xbf16>
    %cst_21 = arith.constant dense<0.000000e+00> : vector<8x256xf32>
    %52 = tpu.matmul %51, %9, %cst_21 {dimension_numbers = #tpu.dot_dimension_numbers<[1], [0], [0], [1], [0, 0, 1, 1], [], []>} : vector<8x64xbf16>, vector<64x256xbf16>, vector<8x256xf32> -> vector<8x256xf32>
    %53 = arith.addf %50, %52 : vector<8x256xf32>
    %54 = math.tanh %53 : vector<8x256xf32>
    %55 = vector.extract_strided_slice %54 {offsets = [0, 0], sizes = [8, 192], strides = [1, 1]} : vector<8x256xf32> to vector<8x192xf32>
    %cst_22 = arith.constant 5.000000e-01 : f32
    %56 = vector.broadcast %cst_22 : f32 to vector<8x192xf32>
    %57 = arith.mulf %56, %55 : vector<8x192xf32>
    %cst_23 = arith.constant 5.000000e-01 : f32
    %58 = vector.broadcast %cst_23 : f32 to vector<8x192xf32>
    %59 = arith.addf %57, %58 : vector<8x192xf32>
    %60 = vector.extract_strided_slice %59 {offsets = [0, 0], sizes = [8, 64], strides = [1, 1]} : vector<8x192xf32> to vector<8x64xf32>
    %61 = vector.extract_strided_slice %59 {offsets = [0, 64], sizes = [8, 64], strides = [1, 1]} : vector<8x192xf32> to vector<8x64xf32>
    %62 = vector.extract_strided_slice %59 {offsets = [0, 128], sizes = [8, 64], strides = [1, 1]} : vector<8x192xf32> to vector<8x64xf32>
    %63 = vector.extract_strided_slice %54 {offsets = [0, 192], sizes = [8, 64], strides = [1, 1]} : vector<8x256xf32> to vector<8x64xf32>
    %64 = arith.mulf %61, %47 : vector<8x64xf32>
    %65 = arith.mulf %60, %63 : vector<8x64xf32>
    %66 = arith.addf %64, %65 : vector<8x64xf32>
    %67 = math.tanh %66 : vector<8x64xf32>
    %68 = arith.mulf %62, %67 : vector<8x64xf32>
    %c24 = arith.constant 24 : index
    %c0_24 = arith.constant 0 : index
    %69 = vector.load %arg5[%c24, %c0_24] : memref<96x256xf32, #tpu.memory_space<vmem>>, vector<8x256xf32>
    %70 = arith.truncf %68 : vector<8x64xf32> to vector<8x64xbf16>
    %cst_25 = arith.constant dense<0.000000e+00> : vector<8x256xf32>
    %71 = tpu.matmul %70, %9, %cst_25 {dimension_numbers = #tpu.dot_dimension_numbers<[1], [0], [0], [1], [0, 0, 1, 1], [], []>} : vector<8x64xbf16>, vector<64x256xbf16>, vector<8x256xf32> -> vector<8x256xf32>
    %72 = arith.addf %69, %71 : vector<8x256xf32>
    %73 = math.tanh %72 : vector<8x256xf32>
    %74 = vector.extract_strided_slice %73 {offsets = [0, 0], sizes = [8, 192], strides = [1, 1]} : vector<8x256xf32> to vector<8x192xf32>
    %cst_26 = arith.constant 5.000000e-01 : f32
    %75 = vector.broadcast %cst_26 : f32 to vector<8x192xf32>
    %76 = arith.mulf %75, %74 : vector<8x192xf32>
    %cst_27 = arith.constant 5.000000e-01 : f32
    %77 = vector.broadcast %cst_27 : f32 to vector<8x192xf32>
    %78 = arith.addf %76, %77 : vector<8x192xf32>
    %79 = vector.extract_strided_slice %78 {offsets = [0, 0], sizes = [8, 64], strides = [1, 1]} : vector<8x192xf32> to vector<8x64xf32>
    %80 = vector.extract_strided_slice %78 {offsets = [0, 64], sizes = [8, 64], strides = [1, 1]} : vector<8x192xf32> to vector<8x64xf32>
    %81 = vector.extract_strided_slice %78 {offsets = [0, 128], sizes = [8, 64], strides = [1, 1]} : vector<8x192xf32> to vector<8x64xf32>
    %82 = vector.extract_strided_slice %73 {offsets = [0, 192], sizes = [8, 64], strides = [1, 1]} : vector<8x256xf32> to vector<8x64xf32>
    %83 = arith.mulf %80, %66 : vector<8x64xf32>
    %84 = arith.mulf %79, %82 : vector<8x64xf32>
    %85 = arith.addf %83, %84 : vector<8x64xf32>
    %86 = math.tanh %85 : vector<8x64xf32>
    %87 = arith.mulf %81, %86 : vector<8x64xf32>
    %c32 = arith.constant 32 : index
    %c0_28 = arith.constant 0 : index
    %88 = vector.load %arg5[%c32, %c0_28] : memref<96x256xf32, #tpu.memory_space<vmem>>, vector<8x256xf32>
    %89 = arith.truncf %87 : vector<8x64xf32> to vector<8x64xbf16>
    %cst_29 = arith.constant dense<0.000000e+00> : vector<8x256xf32>
    %90 = tpu.matmul %89, %9, %cst_29 {dimension_numbers = #tpu.dot_dimension_numbers<[1], [0], [0], [1], [0, 0, 1, 1], [], []>} : vector<8x64xbf16>, vector<64x256xbf16>, vector<8x256xf32> -> vector<8x256xf32>
    %91 = arith.addf %88, %90 : vector<8x256xf32>
    %92 = math.tanh %91 : vector<8x256xf32>
    %93 = vector.extract_strided_slice %92 {offsets = [0, 0], sizes = [8, 192], strides = [1, 1]} : vector<8x256xf32> to vector<8x192xf32>
    %cst_30 = arith.constant 5.000000e-01 : f32
    %94 = vector.broadcast %cst_30 : f32 to vector<8x192xf32>
    %95 = arith.mulf %94, %93 : vector<8x192xf32>
    %cst_31 = arith.constant 5.000000e-01 : f32
    %96 = vector.broadcast %cst_31 : f32 to vector<8x192xf32>
    %97 = arith.addf %95, %96 : vector<8x192xf32>
    %98 = vector.extract_strided_slice %97 {offsets = [0, 0], sizes = [8, 64], strides = [1, 1]} : vector<8x192xf32> to vector<8x64xf32>
    %99 = vector.extract_strided_slice %97 {offsets = [0, 64], sizes = [8, 64], strides = [1, 1]} : vector<8x192xf32> to vector<8x64xf32>
    %100 = vector.extract_strided_slice %97 {offsets = [0, 128], sizes = [8, 64], strides = [1, 1]} : vector<8x192xf32> to vector<8x64xf32>
    %101 = vector.extract_strided_slice %92 {offsets = [0, 192], sizes = [8, 64], strides = [1, 1]} : vector<8x256xf32> to vector<8x64xf32>
    %102 = arith.mulf %99, %85 : vector<8x64xf32>
    %103 = arith.mulf %98, %101 : vector<8x64xf32>
    %104 = arith.addf %102, %103 : vector<8x64xf32>
    %105 = math.tanh %104 : vector<8x64xf32>
    %106 = arith.mulf %100, %105 : vector<8x64xf32>
    %c40 = arith.constant 40 : index
    %c0_32 = arith.constant 0 : index
    %107 = vector.load %arg5[%c40, %c0_32] : memref<96x256xf32, #tpu.memory_space<vmem>>, vector<8x256xf32>
    %108 = arith.truncf %106 : vector<8x64xf32> to vector<8x64xbf16>
    %cst_33 = arith.constant dense<0.000000e+00> : vector<8x256xf32>
    %109 = tpu.matmul %108, %9, %cst_33 {dimension_numbers = #tpu.dot_dimension_numbers<[1], [0], [0], [1], [0, 0, 1, 1], [], []>} : vector<8x64xbf16>, vector<64x256xbf16>, vector<8x256xf32> -> vector<8x256xf32>
    %110 = arith.addf %107, %109 : vector<8x256xf32>
    %111 = math.tanh %110 : vector<8x256xf32>
    %112 = vector.extract_strided_slice %111 {offsets = [0, 0], sizes = [8, 192], strides = [1, 1]} : vector<8x256xf32> to vector<8x192xf32>
    %cst_34 = arith.constant 5.000000e-01 : f32
    %113 = vector.broadcast %cst_34 : f32 to vector<8x192xf32>
    %114 = arith.mulf %113, %112 : vector<8x192xf32>
    %cst_35 = arith.constant 5.000000e-01 : f32
    %115 = vector.broadcast %cst_35 : f32 to vector<8x192xf32>
    %116 = arith.addf %114, %115 : vector<8x192xf32>
    %117 = vector.extract_strided_slice %116 {offsets = [0, 0], sizes = [8, 64], strides = [1, 1]} : vector<8x192xf32> to vector<8x64xf32>
    %118 = vector.extract_strided_slice %116 {offsets = [0, 64], sizes = [8, 64], strides = [1, 1]} : vector<8x192xf32> to vector<8x64xf32>
    %119 = vector.extract_strided_slice %116 {offsets = [0, 128], sizes = [8, 64], strides = [1, 1]} : vector<8x192xf32> to vector<8x64xf32>
    %120 = vector.extract_strided_slice %111 {offsets = [0, 192], sizes = [8, 64], strides = [1, 1]} : vector<8x256xf32> to vector<8x64xf32>
    %121 = arith.mulf %118, %104 : vector<8x64xf32>
    %122 = arith.mulf %117, %120 : vector<8x64xf32>
    %123 = arith.addf %121, %122 : vector<8x64xf32>
    %124 = math.tanh %123 : vector<8x64xf32>
    %125 = arith.mulf %119, %124 : vector<8x64xf32>
    %c48 = arith.constant 48 : index
    %c0_36 = arith.constant 0 : index
    %126 = vector.load %arg5[%c48, %c0_36] : memref<96x256xf32, #tpu.memory_space<vmem>>, vector<8x256xf32>
    %127 = arith.truncf %125 : vector<8x64xf32> to vector<8x64xbf16>
    %cst_37 = arith.constant dense<0.000000e+00> : vector<8x256xf32>
    %128 = tpu.matmul %127, %9, %cst_37 {dimension_numbers = #tpu.dot_dimension_numbers<[1], [0], [0], [1], [0, 0, 1, 1], [], []>} : vector<8x64xbf16>, vector<64x256xbf16>, vector<8x256xf32> -> vector<8x256xf32>
    %129 = arith.addf %126, %128 : vector<8x256xf32>
    %130 = math.tanh %129 : vector<8x256xf32>
    %131 = vector.extract_strided_slice %130 {offsets = [0, 0], sizes = [8, 192], strides = [1, 1]} : vector<8x256xf32> to vector<8x192xf32>
    %cst_38 = arith.constant 5.000000e-01 : f32
    %132 = vector.broadcast %cst_38 : f32 to vector<8x192xf32>
    %133 = arith.mulf %132, %131 : vector<8x192xf32>
    %cst_39 = arith.constant 5.000000e-01 : f32
    %134 = vector.broadcast %cst_39 : f32 to vector<8x192xf32>
    %135 = arith.addf %133, %134 : vector<8x192xf32>
    %136 = vector.extract_strided_slice %135 {offsets = [0, 0], sizes = [8, 64], strides = [1, 1]} : vector<8x192xf32> to vector<8x64xf32>
    %137 = vector.extract_strided_slice %135 {offsets = [0, 64], sizes = [8, 64], strides = [1, 1]} : vector<8x192xf32> to vector<8x64xf32>
    %138 = vector.extract_strided_slice %135 {offsets = [0, 128], sizes = [8, 64], strides = [1, 1]} : vector<8x192xf32> to vector<8x64xf32>
    %139 = vector.extract_strided_slice %130 {offsets = [0, 192], sizes = [8, 64], strides = [1, 1]} : vector<8x256xf32> to vector<8x64xf32>
    %140 = arith.mulf %137, %123 : vector<8x64xf32>
    %141 = arith.mulf %136, %139 : vector<8x64xf32>
    %142 = arith.addf %140, %141 : vector<8x64xf32>
    %143 = math.tanh %142 : vector<8x64xf32>
    %144 = arith.mulf %138, %143 : vector<8x64xf32>
    %c56 = arith.constant 56 : index
    %c0_40 = arith.constant 0 : index
    %145 = vector.load %arg5[%c56, %c0_40] : memref<96x256xf32, #tpu.memory_space<vmem>>, vector<8x256xf32>
    %146 = arith.truncf %144 : vector<8x64xf32> to vector<8x64xbf16>
    %cst_41 = arith.constant dense<0.000000e+00> : vector<8x256xf32>
    %147 = tpu.matmul %146, %9, %cst_41 {dimension_numbers = #tpu.dot_dimension_numbers<[1], [0], [0], [1], [0, 0, 1, 1], [], []>} : vector<8x64xbf16>, vector<64x256xbf16>, vector<8x256xf32> -> vector<8x256xf32>
    %148 = arith.addf %145, %147 : vector<8x256xf32>
    %149 = math.tanh %148 : vector<8x256xf32>
    %150 = vector.extract_strided_slice %149 {offsets = [0, 0], sizes = [8, 192], strides = [1, 1]} : vector<8x256xf32> to vector<8x192xf32>
    %cst_42 = arith.constant 5.000000e-01 : f32
    %151 = vector.broadcast %cst_42 : f32 to vector<8x192xf32>
    %152 = arith.mulf %151, %150 : vector<8x192xf32>
    %cst_43 = arith.constant 5.000000e-01 : f32
    %153 = vector.broadcast %cst_43 : f32 to vector<8x192xf32>
    %154 = arith.addf %152, %153 : vector<8x192xf32>
    %155 = vector.extract_strided_slice %154 {offsets = [0, 0], sizes = [8, 64], strides = [1, 1]} : vector<8x192xf32> to vector<8x64xf32>
    %156 = vector.extract_strided_slice %154 {offsets = [0, 64], sizes = [8, 64], strides = [1, 1]} : vector<8x192xf32> to vector<8x64xf32>
    %157 = vector.extract_strided_slice %154 {offsets = [0, 128], sizes = [8, 64], strides = [1, 1]} : vector<8x192xf32> to vector<8x64xf32>
    %158 = vector.extract_strided_slice %149 {offsets = [0, 192], sizes = [8, 64], strides = [1, 1]} : vector<8x256xf32> to vector<8x64xf32>
    %159 = arith.mulf %156, %142 : vector<8x64xf32>
    %160 = arith.mulf %155, %158 : vector<8x64xf32>
    %161 = arith.addf %159, %160 : vector<8x64xf32>
    %162 = math.tanh %161 : vector<8x64xf32>
    %163 = arith.mulf %157, %162 : vector<8x64xf32>
    %c64 = arith.constant 64 : index
    %c0_44 = arith.constant 0 : index
    %164 = vector.load %arg5[%c64, %c0_44] : memref<96x256xf32, #tpu.memory_space<vmem>>, vector<8x256xf32>
    %165 = arith.truncf %163 : vector<8x64xf32> to vector<8x64xbf16>
    %cst_45 = arith.constant dense<0.000000e+00> : vector<8x256xf32>
    %166 = tpu.matmul %165, %9, %cst_45 {dimension_numbers = #tpu.dot_dimension_numbers<[1], [0], [0], [1], [0, 0, 1, 1], [], []>} : vector<8x64xbf16>, vector<64x256xbf16>, vector<8x256xf32> -> vector<8x256xf32>
    %167 = arith.addf %164, %166 : vector<8x256xf32>
    %168 = math.tanh %167 : vector<8x256xf32>
    %169 = vector.extract_strided_slice %168 {offsets = [0, 0], sizes = [8, 192], strides = [1, 1]} : vector<8x256xf32> to vector<8x192xf32>
    %cst_46 = arith.constant 5.000000e-01 : f32
    %170 = vector.broadcast %cst_46 : f32 to vector<8x192xf32>
    %171 = arith.mulf %170, %169 : vector<8x192xf32>
    %cst_47 = arith.constant 5.000000e-01 : f32
    %172 = vector.broadcast %cst_47 : f32 to vector<8x192xf32>
    %173 = arith.addf %171, %172 : vector<8x192xf32>
    %174 = vector.extract_strided_slice %173 {offsets = [0, 0], sizes = [8, 64], strides = [1, 1]} : vector<8x192xf32> to vector<8x64xf32>
    %175 = vector.extract_strided_slice %173 {offsets = [0, 64], sizes = [8, 64], strides = [1, 1]} : vector<8x192xf32> to vector<8x64xf32>
    %176 = vector.extract_strided_slice %173 {offsets = [0, 128], sizes = [8, 64], strides = [1, 1]} : vector<8x192xf32> to vector<8x64xf32>
    %177 = vector.extract_strided_slice %168 {offsets = [0, 192], sizes = [8, 64], strides = [1, 1]} : vector<8x256xf32> to vector<8x64xf32>
    %178 = arith.mulf %175, %161 : vector<8x64xf32>
    %179 = arith.mulf %174, %177 : vector<8x64xf32>
    %180 = arith.addf %178, %179 : vector<8x64xf32>
    %181 = math.tanh %180 : vector<8x64xf32>
    %182 = arith.mulf %176, %181 : vector<8x64xf32>
    %c72 = arith.constant 72 : index
    %c0_48 = arith.constant 0 : index
    %183 = vector.load %arg5[%c72, %c0_48] : memref<96x256xf32, #tpu.memory_space<vmem>>, vector<8x256xf32>
    %184 = arith.truncf %182 : vector<8x64xf32> to vector<8x64xbf16>
    %cst_49 = arith.constant dense<0.000000e+00> : vector<8x256xf32>
    %185 = tpu.matmul %184, %9, %cst_49 {dimension_numbers = #tpu.dot_dimension_numbers<[1], [0], [0], [1], [0, 0, 1, 1], [], []>} : vector<8x64xbf16>, vector<64x256xbf16>, vector<8x256xf32> -> vector<8x256xf32>
    %186 = arith.addf %183, %185 : vector<8x256xf32>
    %187 = math.tanh %186 : vector<8x256xf32>
    %188 = vector.extract_strided_slice %187 {offsets = [0, 0], sizes = [8, 192], strides = [1, 1]} : vector<8x256xf32> to vector<8x192xf32>
    %cst_50 = arith.constant 5.000000e-01 : f32
    %189 = vector.broadcast %cst_50 : f32 to vector<8x192xf32>
    %190 = arith.mulf %189, %188 : vector<8x192xf32>
    %cst_51 = arith.constant 5.000000e-01 : f32
    %191 = vector.broadcast %cst_51 : f32 to vector<8x192xf32>
    %192 = arith.addf %190, %191 : vector<8x192xf32>
    %193 = vector.extract_strided_slice %192 {offsets = [0, 0], sizes = [8, 64], strides = [1, 1]} : vector<8x192xf32> to vector<8x64xf32>
    %194 = vector.extract_strided_slice %192 {offsets = [0, 64], sizes = [8, 64], strides = [1, 1]} : vector<8x192xf32> to vector<8x64xf32>
    %195 = vector.extract_strided_slice %192 {offsets = [0, 128], sizes = [8, 64], strides = [1, 1]} : vector<8x192xf32> to vector<8x64xf32>
    %196 = vector.extract_strided_slice %187 {offsets = [0, 192], sizes = [8, 64], strides = [1, 1]} : vector<8x256xf32> to vector<8x64xf32>
    %197 = arith.mulf %194, %180 : vector<8x64xf32>
    %198 = arith.mulf %193, %196 : vector<8x64xf32>
    %199 = arith.addf %197, %198 : vector<8x64xf32>
    %200 = math.tanh %199 : vector<8x64xf32>
    %201 = arith.mulf %195, %200 : vector<8x64xf32>
    %c80 = arith.constant 80 : index
    %c0_52 = arith.constant 0 : index
    %202 = vector.load %arg5[%c80, %c0_52] : memref<96x256xf32, #tpu.memory_space<vmem>>, vector<8x256xf32>
    %203 = arith.truncf %201 : vector<8x64xf32> to vector<8x64xbf16>
    %cst_53 = arith.constant dense<0.000000e+00> : vector<8x256xf32>
    %204 = tpu.matmul %203, %9, %cst_53 {dimension_numbers = #tpu.dot_dimension_numbers<[1], [0], [0], [1], [0, 0, 1, 1], [], []>} : vector<8x64xbf16>, vector<64x256xbf16>, vector<8x256xf32> -> vector<8x256xf32>
    %205 = arith.addf %202, %204 : vector<8x256xf32>
    %206 = math.tanh %205 : vector<8x256xf32>
    %207 = vector.extract_strided_slice %206 {offsets = [0, 0], sizes = [8, 192], strides = [1, 1]} : vector<8x256xf32> to vector<8x192xf32>
    %cst_54 = arith.constant 5.000000e-01 : f32
    %208 = vector.broadcast %cst_54 : f32 to vector<8x192xf32>
    %209 = arith.mulf %208, %207 : vector<8x192xf32>
    %cst_55 = arith.constant 5.000000e-01 : f32
    %210 = vector.broadcast %cst_55 : f32 to vector<8x192xf32>
    %211 = arith.addf %209, %210 : vector<8x192xf32>
    %212 = vector.extract_strided_slice %211 {offsets = [0, 0], sizes = [8, 64], strides = [1, 1]} : vector<8x192xf32> to vector<8x64xf32>
    %213 = vector.extract_strided_slice %211 {offsets = [0, 64], sizes = [8, 64], strides = [1, 1]} : vector<8x192xf32> to vector<8x64xf32>
    %214 = vector.extract_strided_slice %211 {offsets = [0, 128], sizes = [8, 64], strides = [1, 1]} : vector<8x192xf32> to vector<8x64xf32>
    %215 = vector.extract_strided_slice %206 {offsets = [0, 192], sizes = [8, 64], strides = [1, 1]} : vector<8x256xf32> to vector<8x64xf32>
    %216 = arith.mulf %213, %199 : vector<8x64xf32>
    %217 = arith.mulf %212, %215 : vector<8x64xf32>
    %218 = arith.addf %216, %217 : vector<8x64xf32>
    %219 = math.tanh %218 : vector<8x64xf32>
    %220 = arith.mulf %214, %219 : vector<8x64xf32>
    %c88 = arith.constant 88 : index
    %c0_56 = arith.constant 0 : index
    %221 = vector.load %arg5[%c88, %c0_56] : memref<96x256xf32, #tpu.memory_space<vmem>>, vector<8x256xf32>
    %222 = arith.truncf %220 : vector<8x64xf32> to vector<8x64xbf16>
    %cst_57 = arith.constant dense<0.000000e+00> : vector<8x256xf32>
    %223 = tpu.matmul %222, %9, %cst_57 {dimension_numbers = #tpu.dot_dimension_numbers<[1], [0], [0], [1], [0, 0, 1, 1], [], []>} : vector<8x64xbf16>, vector<64x256xbf16>, vector<8x256xf32> -> vector<8x256xf32>
    %224 = arith.addf %221, %223 : vector<8x256xf32>
    %225 = math.tanh %224 : vector<8x256xf32>
    %226 = vector.extract_strided_slice %225 {offsets = [0, 0], sizes = [8, 192], strides = [1, 1]} : vector<8x256xf32> to vector<8x192xf32>
    %cst_58 = arith.constant 5.000000e-01 : f32
    %227 = vector.broadcast %cst_58 : f32 to vector<8x192xf32>
    %228 = arith.mulf %227, %226 : vector<8x192xf32>
    %cst_59 = arith.constant 5.000000e-01 : f32
    %229 = vector.broadcast %cst_59 : f32 to vector<8x192xf32>
    %230 = arith.addf %228, %229 : vector<8x192xf32>
    %231 = vector.extract_strided_slice %230 {offsets = [0, 0], sizes = [8, 64], strides = [1, 1]} : vector<8x192xf32> to vector<8x64xf32>
    %232 = vector.extract_strided_slice %230 {offsets = [0, 64], sizes = [8, 64], strides = [1, 1]} : vector<8x192xf32> to vector<8x64xf32>
    %233 = vector.extract_strided_slice %230 {offsets = [0, 128], sizes = [8, 64], strides = [1, 1]} : vector<8x192xf32> to vector<8x64xf32>
    %234 = vector.extract_strided_slice %225 {offsets = [0, 192], sizes = [8, 64], strides = [1, 1]} : vector<8x256xf32> to vector<8x64xf32>
    %235 = arith.mulf %232, %218 : vector<8x64xf32>
    %236 = arith.mulf %231, %234 : vector<8x64xf32>
    %237 = arith.addf %235, %236 : vector<8x64xf32>
    %238 = math.tanh %237 : vector<8x64xf32>
    %239 = arith.mulf %233, %238 : vector<8x64xf32>
    %c2 = arith.constant 2 : index
    %c0_60 = arith.constant 0 : index
    %240 = vector.load %arg3[%c2, %c0_60] : memref<3x256xf32, #tpu.memory_space<vmem>>, vector<1x64xf32>
    %c2_61 = arith.constant 2 : index
    %c64_62 = arith.constant 64 : index
    %241 = vector.load %arg3[%c2_61, %c64_62] : memref<3x256xf32, #tpu.memory_space<vmem>>, vector<1x1xf32>
    %242 = vector.broadcast %240 : vector<1x64xf32> to vector<8x64xf32>
    %243 = arith.mulf %239, %242 : vector<8x64xf32>
    %cst_63 = arith.constant dense<0.000000e+00> : vector<8xf32>
    %244 = vector.multi_reduction <add>, %243, %cst_63 [1] : vector<8x64xf32> to vector<8xf32>
    %245 = vector.shape_cast %244 : vector<8xf32> to vector<8x1xf32>
    %246 = vector.broadcast %241 : vector<1x1xf32> to vector<8x1xf32>
    %247 = arith.addf %245, %246 : vector<8x1xf32>
    %c0_64 = arith.constant 0 : index
    %c0_65 = arith.constant 0 : index
    %248 = vector.load %arg4[%c0_64, %c0_65] : memref<8x1xf32, #tpu.memory_space<vmem>>, vector<8x1xf32>
    tpu.vector_store %arg4[%c0_64, %c0_65], %247 {strides = array<i32>} : memref<8x1xf32, #tpu.memory_space<vmem>>, vector<8x1xf32>,
    return
  }
}

</mosaic_0001>

<bundles_post_ra>
// kernel: lstm_predict.1
= control target key start
LH: loop header
LB: loop body
LE: loop exit
PB: predicated region body
PF: predicated region fallthrough
CT: control target
= control target key end

     0   :  { %v92_v0 = vlaneseq  ;;  %v1236_v2 = vmov 0   ;;  %s1237_s7 = smov 64   ;;  %vm240_vm0 = vcmask 523264   ;;  %vm1120_vm1 = vcmask 7168   ;;  %s1578_s2 = inlined_call_operand.vmem [shape: bf16[64,256], index: 2, kind: input, shape index: {}]   ;;  %s1579_s0 = inlined_call_operand.vmem [shape: f32[96,1], index: 0, kind: input, shape index: {}]   ;;  %s1580_s3 = inlined_call_operand.vmem [shape: f32[3,256], index: 3, kind: input, shape index: {}]   ;;  %s1581_s1 = inlined_call_operand.vmem [shape: f32[16,64], index: 1, kind: input, shape index: {}]   ;;  %s1582_s4 = inlined_call_operand.vmem [shape: f32[8,1], index: 4, kind: output, shape index: {}]  }
   0x1   :  { %v1266_v1 = vld [vmem:[%s1578_s2 + $0x4] ss:$8 sps:$4 sm:$0xff]   ;;  %276 = vmatprep.mubr.bf16.mxu0 %v1236_v2  ;;  %1150 = vset.pattern.permute.xlu0 %v1236_v2  ;;  %v1273_v3 = vld [vmem:[%s1578_s2] ss:$8 sps:$4 sm:$0xff]   ;;  %v1283_v5 = vld [vmem:[%s1578_s2 + $0x14] ss:$8 sps:$4 sm:$0xff]  }
   0x2   :  { %v1275_v4 = vshrl.u32 %v92_v0, 7  ;;  %352 = vmatprep.mubr.bf16.mxu1 %v1236_v2  ;;  %1151 = vset.pattern.permute.xlu1 %v1236_v2  ;;  %v1290_v6 = vld [vmem:[%s1578_s2 + $0x10] ss:$8 sps:$4 sm:$0xff]   ;;  %v1298_v8 = vld [vmem:[%s1578_s2 + $0x24] ss:$8 sps:$4 sm:$0xff]  }
   0x3   :  { %244 = vmatprep.subr.bf16.mxu0 %v1266_v1  ;;  %320 = vmatprep.subr.bf16.mxu1 %v1266_v1  ;;  %v18_v9 = vld [vmem:[%s1579_s0] sm:$0xff]  ;;  %v196_v10 = vld [vmem:[%s1581_s1 + $0x8] sm:$0xff]  ;;  %v1323_v14 = vld [vmem:[%s1578_s2 + $0x34] ss:$8 sps:$4 sm:$0xff]  }
   0x4   :  { %245 = vmatpush1.bf16.msra.mxu0 %v1273_v3  ;;  %v94_v7 = vsub.s32 0, %v1275_v4  ;;  %321 = vmatpush1.bf16.msra.mxu1 %v1273_v3  ;;  %v30_v11 = vld [vmem:[%s1580_s3] ss:$4 sm:$0x3]  ;;  %v1331_v15 = vld [vmem:[%s1578_s2 + $0x30] ss:$8 sps:$4 sm:$0xff]  }
   0x5   :  { %246 = vmatprep.subr.bf16.mxu0 %v1283_v5  ;;  %322 = vmatprep.subr.bf16.mxu1 %v1283_v5  ;;  %v1314_v12 = vld [vmem:[%s1578_s2 + $0x20] ss:$8 sps:$4 sm:$0xff]   ;;  %v98_v18 = vsub.s32 1, %v1275_v4 }
   0x6   :  { %33 = vperm.xlu0 %1150, %v18_v9   ;;  %294 = vrot.lane.b32.xlu1 %v196_v10, %s1237_s7  ;;  %v1317_v13 = vrot.slane %v30_v11, %v94_v7  ;;  %v195_v16 = vld [vmem:[%s1581_s1] sm:$0xff]  ;;  %v19_v44 = vld [vmem:[%s1579_s0 + $0x8] sm:$0xff]  ;;  %v20_v10 = vld [vmem:[%s1579_s0 + $0x10] sm:$0xff] }
   0x7   :  { %v199_v17 = vpack.c.bf16 %v195_v16, %v195_v16  ;;  %v1354_v19 = vrot.slane %v30_v11, %v98_v18  ;;  %v1126_v21 = vld [vmem:[%s1580_s3 + $0x1] ss:$4 sm:$0x3] }
   0x8   :  { %247 = vmatpush1.bf16.msra.mxu0 %v1290_v6  ;;  %323 = vmatpush1.bf16.msra.mxu1 %v1290_v6  ;;  %v1360_v23 = vrot.slane %v1126_v21, %v98_v18  ;;  %v1365_v32 = vrot.slane %v1126_v21, %v94_v7 }
   0x9   :  { %248 = vmatprep.subr.bf16.mxu0 %v1298_v8  ;;  %324 = vmatprep.subr.bf16.mxu1 %v1298_v8 }
   0xc   :  { %249 = vmatpush1.bf16.msra.mxu0 %v1314_v12  ;;  %325 = vmatpush1.bf16.msra.mxu1 %v1314_v12 }
   0xd   :  { %250 = vmatprep.subr.bf16.mxu0 %v1323_v14  ;;  %326 = vmatprep.subr.bf16.mxu1 %v1323_v14 }
  0x10   :  { %251 = vmatpush1.bf16.msra.mxu0 %v1331_v15  ;;  %327 = vmatpush1.bf16.msra.mxu1 %v1331_v15 }
  0x11   :  { %392 = vmatprep.subr.bf16.mxu0 %v1266_v1  ;;  %464 = vmatprep.subr.bf16.mxu1 %v1266_v1 }
  0x13   :  { %1135 = vmatmul.mubr.msk.bf16.vlgmr.msra.gmra.mrb[0].mxu0 %vm240_vm0, %v199_v17 }
  0x14   :  { %393 = vmatpush1.bf16.msra.mxu0 %v1273_v3  ;;  %424 = vmatprep.mubr.bf16.mxu0 %v1236_v2 }
  0x15   :  { %394 = vmatprep.subr.bf16.mxu0 %v1283_v5 }
  0x18   :  { %395 = vmatpush1.bf16.msra.mxu0 %v1290_v6 }
  0x19   :  { %396 = vmatprep.subr.bf16.mxu0 %v1298_v8 }
  0x1c   :  { %397 = vmatpush1.bf16.msra.mxu0 %v1314_v12 }
  0x1d   :  { %398 = vmatprep.subr.bf16.mxu0 %v1323_v14 }
  0x20   :  { %399 = vmatpush1.bf16.msra.mxu0 %v1331_v15 }
  0x21   :  { %536 = vmatprep.subr.bf16.mxu0 %v1266_v1 }
  0x78   :  { %v295_v40 = vpop.permute.xlu1 %294 }
  0x85   :  { %v34_v20 = vpop.permute.xlu0 %33 }
  0x86   :  { %v103_v22 = vmul.f32 %v1354_v19, %v34_v20  ;;  %v102_v31 = vmul.f32 %v1317_v13, %v34_v20 }
  0x88   :  { %v140_v24 = vadd.f32 %v1360_v23, %v103_v22  ;;  %v139_v33 = vadd.f32 %v1365_v32, %v102_v31 }
  0xe6   :  { %v278_v25 = vpop.f32.mrb[0].mxu0 }
  0xe7   :  { %v280_v26 = vpop.f32.mrb[1].mxu0  ;;  %v285_v34 = vadd.f32 %v278_v25, %v139_v33 }
  0xe8   :  { %v286_v27 = vadd.f32 %v280_v26, %v140_v24  ;;  %v282_v28 = vpop.f32.mrb[2].mxu0 }
  0xe9   :  { %v283_v29 = vpop.f32.mrb[3].mxu0 }
  0xea   :  { %1164 = vtanh.f32 %v286_v27 }
  0xeb   :  { %1166 = vtanh.f32 %v285_v34 }
  0xf4   :  { %v1165_v30 = vpop.eup %1164 }
  0xf5   :  { %299 = vrot.lane.b32.xlu0 %v1165_v30, %s1237_s7  ;;  %v1167_v35 = vpop.eup %1166  ;;  %v290_v46 = vmul.f32 0.5, %v1165_v30 }
  0xf6   :  { %v289_v36 = vmul.f32 0.5, %v1167_v35 }
  0xf7   :  { %v292_v47 = vadd.f32 0.5, %v290_v46 }
  0xf8   :  { %v291_v37 = vadd.f32 0.5, %v289_v36 }
  0xfa   :  { %v297_v41 = vmul.f32 %v295_v40, %v291_v37 }
 0x167   :  { %v300_v38 = vpop.permute.xlu0 %299 }
 0x168   :  { %v302_v39 = vmul.f32 %v300_v38, %v291_v37 }
 0x16a   :  { %304 = vrot.lane.b32.xlu1 %v302_v39, %s1237_s7 }
 0x16e   :  { %38 = vperm.xlu1 %1151, %v19_v44   ;;  %v21_v44 = vld [vmem:[%s1579_s0 + $0x18] sm:$0xff] }
 0x1dc   :  { %v305_v42 = vpop.permute.xlu1 %304 }
 0x1dd   :  { %v307_v43 = vadd.f32 %v305_v42, %v297_v41 }
 0x1df   :  { %1168 = vtanh.f32 %v307_v43 }
 0x1e9   :  { %v1169_v45 = vpop.eup %1168 }
 0x1ea   :  { %310 = vrot.lane.b32.xlu0 %v1169_v45, %s1237_s7 }
 0x1ed   :  { %v39_v51 = vpop.permute.xlu1 %38 }
 0x1ee   :  { %v105_v52 = vmul.f32 %v1354_v19, %v39_v51  ;;  %v104_v60 = vmul.f32 %v1317_v13, %v39_v51 }
 0x1f0   :  { %v142_v53 = vadd.f32 %v1360_v23, %v105_v52  ;;  %v141_v61 = vadd.f32 %v1365_v32, %v104_v60 }
 0x25c   :  { %v311_v48 = vpop.permute.xlu0 %310 }
 0x25d   :  { %v313_v49 = vmul.f32 %v311_v48, %v292_v47 }
 0x25f   :  { %v316_v50 = vpack.c.bf16 %v313_v49, %v313_v49 }
 0x261   :  { %1136 = vmatmul.mubr.msk.bf16.vlgmr.msra.gmra.mrb[0].mxu1 %vm240_vm0, %v316_v50 }
 0x262   :  { %465 = vmatpush1.bf16.msra.mxu1 %v1273_v3  ;;  %496 = vmatprep.mubr.bf16.mxu1 %v1236_v2 }
 0x263   :  { %466 = vmatprep.subr.bf16.mxu1 %v1283_v5 }
 0x266   :  { %467 = vmatpush1.bf16.msra.mxu1 %v1290_v6 }
 0x267   :  { %468 = vmatprep.subr.bf16.mxu1 %v1298_v8 }
 0x26a   :  { %469 = vmatpush1.bf16.msra.mxu1 %v1314_v12 }
 0x26b   :  { %470 = vmatprep.subr.bf16.mxu1 %v1323_v14 }
 0x26e   :  { %471 = vmatpush1.bf16.msra.mxu1 %v1331_v15 }
 0x26f   :  { %608 = vmatprep.subr.bf16.mxu1 %v1266_v1 }
 0x334   :  { %v354_v54 = vpop.f32.mrb[0].mxu1 }
 0x335   :  { %v356_v55 = vpop.f32.mrb[1].mxu1  ;;  %v361_v62 = vadd.f32 %v354_v54, %v141_v61 }
 0x336   :  { %v362_v56 = vadd.f32 %v356_v55, %v142_v53  ;;  %v358_v57 = vpop.f32.mrb[2].mxu1 }
 0x337   :  { %v359_v58 = vpop.f32.mrb[3].mxu1 }
 0x338   :  { %1170 = vtanh.f32 %v362_v56 }
 0x339   :  { %1172 = vtanh.f32 %v361_v62 }
 0x342   :  { %v1171_v59 = vpop.eup %1170 }
 0x343   :  { %371 = vrot.lane.b32.xlu0 %v1171_v59, %s1237_s7  ;;  %v1173_v63 = vpop.eup %1172  ;;  %v366_v20 = vmul.f32 0.5, %v1171_v59 }
 0x344   :  { %v365_v0 = vmul.f32 0.5, %v1173_v63 }
 0x345   :  { %v368_v21 = vadd.f32 0.5, %v366_v20 }
 0x346   :  { %v367_v4 = vadd.f32 0.5, %v365_v0 }
 0x348   :  { %v369_v11 = vmul.f32 %v367_v4, %v307_v43 }
 0x3b5   :  { %v372_v7 = vpop.permute.xlu0 %371 }
 0x3b6   :  { %v374_v9 = vmul.f32 %v372_v7, %v367_v4 }
 0x3b8   :  { %376 = vrot.lane.b32.xlu1 %v374_v9, %s1237_s7 }
 0x3bc   :  { %43 = vperm.xlu1 %1151, %v20_v10  }
 0x42a   :  { %v377_v16 = vpop.permute.xlu1 %376 }
 0x42b   :  { %v379_v17 = vadd.f32 %v377_v16, %v369_v11 }
 0x42d   :  { %1174 = vtanh.f32 %v379_v17 }
 0x437   :  { %v1175_v18 = vpop.eup %1174 }
 0x438   :  { %382 = vrot.lane.b32.xlu0 %v1175_v18, %s1237_s7 }
 0x43b   :  { %v44_v26 = vpop.permute.xlu1 %43 }
 0x43c   :  { %v107_v27 = vmul.f32 %v1354_v19, %v44_v26  ;;  %v106_v36 = vmul.f32 %v1317_v13, %v44_v26 }
 0x43e   :  { %v144_v29 = vadd.f32 %v1360_v23, %v107_v27  ;;  %v143_v37 = vadd.f32 %v1365_v32, %v106_v36 }
 0x4aa   :  { %v383_v22 = vpop.permute.xlu0 %382 }
 0x4ab   :  { %v385_v24 = vmul.f32 %v383_v22, %v368_v21 }
 0x4ad   :  { %v388_v25 = vpack.c.bf16 %v385_v24, %v385_v24 }
 0x4af   :  { %1137 = vmatmul.mubr.msk.bf16.vlgmr.msra.gmra.mrb[4].mxu0 %vm240_vm0, %v388_v25 }
 0x4b0   :  { %537 = vmatpush1.bf16.msra.mxu0 %v1273_v3  ;;  %568 = vmatprep.mubr.bf16.mxu0 %v1236_v2 }
 0x4b1   :  { %538 = vmatprep.subr.bf16.mxu0 %v1283_v5 }
 0x4b4   :  { %539 = vmatpush1.bf16.msra.mxu0 %v1290_v6 }
 0x4b5   :  { %540 = vmatprep.subr.bf16.mxu0 %v1298_v8 }
 0x4b8   :  { %541 = vmatpush1.bf16.msra.mxu0 %v1314_v12 }
 0x4b9   :  { %542 = vmatprep.subr.bf16.mxu0 %v1323_v14 }
 0x4bc   :  { %543 = vmatpush1.bf16.msra.mxu0 %v1331_v15 }
 0x4bd   :  { %680 = vmatprep.subr.bf16.mxu0 %v1266_v1 }
 0x582   :  { %v426_v28 = vpop.f32.mrb[4].mxu0 }
 0x583   :  { %v428_v30 = vpop.f32.mrb[5].mxu0  ;;  %v433_v38 = vadd.f32 %v426_v28, %v143_v37 }
 0x584   :  { %v434_v31 = vadd.f32 %v428_v30, %v144_v29  ;;  %v430_v33 = vpop.f32.mrb[6].mxu0 }
 0x585   :  { %v431_v34 = vpop.f32.mrb[7].mxu0 }
 0x586   :  { %1176 = vtanh.f32 %v434_v31 }
 0x587   :  { %1178 = vtanh.f32 %v433_v38 }
 0x590   :  { %v1177_v35 = vpop.eup %1176 }
 0x591   :  { %443 = vrot.lane.b32.xlu0 %v1177_v35, %s1237_s7  ;;  %v1179_v39 = vpop.eup %1178  ;;  %v438_v49 = vmul.f32 0.5, %v1177_v35 }
 0x592   :  { %v437_v40 = vmul.f32 0.5, %v1179_v39 }
 0x593   :  { %v440_v50 = vadd.f32 0.5, %v438_v49 }
 0x594   :  { %v439_v41 = vadd.f32 0.5, %v437_v40 }
 0x596   :  { %v441_v45 = vmul.f32 %v439_v41, %v379_v17  ;;  %v22_v17 = vld [vmem:[%s1579_s0 + $0x20] sm:$0xff] }
 0x603   :  { %v444_v42 = vpop.permute.xlu0 %443 }
 0x604   :  { %v446_v43 = vmul.f32 %v444_v42, %v439_v41 }
 0x606   :  { %448 = vrot.lane.b32.xlu1 %v446_v43, %s1237_s7 }
 0x60a   :  { %48 = vperm.xlu1 %1151, %v21_v44  }
 0x678   :  { %v449_v46 = vpop.permute.xlu1 %448 }
 0x679   :  { %v451_v47 = vadd.f32 %v449_v46, %v441_v45 }
 0x67b   :  { %1180 = vtanh.f32 %v451_v47 }
 0x685   :  { %v1181_v48 = vpop.eup %1180 }
 0x686   :  { %454 = vrot.lane.b32.xlu0 %v1181_v48, %s1237_s7 }
 0x689   :  { %v49_v54 = vpop.permute.xlu1 %48 }
 0x68a   :  { %v109_v55 = vmul.f32 %v1354_v19, %v49_v54  ;;  %v108_v63 = vmul.f32 %v1317_v13, %v49_v54 }
 0x68c   :  { %v146_v57 = vadd.f32 %v1360_v23, %v109_v55  ;;  %v145_v0 = vadd.f32 %v1365_v32, %v108_v63 }
 0x6f8   :  { %v455_v51 = vpop.permute.xlu0 %454 }
 0x6f9   :  { %v457_v52 = vmul.f32 %v455_v51, %v440_v50 }
 0x6fb   :  { %v460_v53 = vpack.c.bf16 %v457_v52, %v457_v52 }
 0x6fd   :  { %1138 = vmatmul.mubr.msk.bf16.vlgmr.msra.gmra.mrb[4].mxu1 %vm240_vm0, %v460_v53 }
 0x6fe   :  { %609 = vmatpush1.bf16.msra.mxu1 %v1273_v3  ;;  %640 = vmatprep.mubr.bf16.mxu1 %v1236_v2 }
 0x6ff   :  { %610 = vmatprep.subr.bf16.mxu1 %v1283_v5 }
 0x702   :  { %611 = vmatpush1.bf16.msra.mxu1 %v1290_v6 }
 0x703   :  { %612 = vmatprep.subr.bf16.mxu1 %v1298_v8 }
 0x706   :  { %613 = vmatpush1.bf16.msra.mxu1 %v1314_v12 }
 0x707   :  { %614 = vmatprep.subr.bf16.mxu1 %v1323_v14 }
 0x70a   :  { %615 = vmatpush1.bf16.msra.mxu1 %v1331_v15 }
 0x70b   :  { %752 = vmatprep.subr.bf16.mxu1 %v1266_v1 }
 0x7d0   :  { %v498_v56 = vpop.f32.mrb[4].mxu1 }
 0x7d1   :  { %v500_v58 = vpop.f32.mrb[5].mxu1  ;;  %v505_v4 = vadd.f32 %v498_v56, %v145_v0 }
 0x7d2   :  { %v506_v59 = vadd.f32 %v500_v58, %v146_v57  ;;  %v502_v60 = vpop.f32.mrb[6].mxu1 }
 0x7d3   :  { %v503_v61 = vpop.f32.mrb[7].mxu1 }
 0x7d4   :  { %1182 = vtanh.f32 %v506_v59 }
 0x7d5   :  { %1184 = vtanh.f32 %v505_v4 }
 0x7de   :  { %v1183_v62 = vpop.eup %1182 }
 0x7df   :  { %515 = vrot.lane.b32.xlu0 %v1183_v62, %s1237_s7  ;;  %v1185_v7 = vpop.eup %1184  ;;  %v510_v24 = vmul.f32 0.5, %v1183_v62 }
 0x7e0   :  { %v509_v9 = vmul.f32 0.5, %v1185_v7 }
 0x7e1   :  { %v512_v25 = vadd.f32 0.5, %v510_v24 }
 0x7e2   :  { %v511_v10 = vadd.f32 0.5, %v509_v9 }
 0x7e4   :  { %v513_v18 = vmul.f32 %v511_v10, %v451_v47  ;;  %v23_v47 = vld [vmem:[%s1579_s0 + $0x28] sm:$0xff] }
 0x851   :  { %v516_v11 = vpop.permute.xlu0 %515 }
 0x852   :  { %v518_v16 = vmul.f32 %v516_v11, %v511_v10 }
 0x854   :  { %520 = vrot.lane.b32.xlu1 %v518_v16, %s1237_s7 }
 0x858   :  { %53 = vperm.xlu1 %1151, %v22_v17  }
 0x8c6   :  { %v521_v20 = vpop.permute.xlu1 %520 }
 0x8c7   :  { %v523_v21 = vadd.f32 %v521_v20, %v513_v18 }
 0x8c9   :  { %1186 = vtanh.f32 %v523_v21 }
 0x8d3   :  { %v1187_v22 = vpop.eup %1186 }
 0x8d4   :  { %526 = vrot.lane.b32.xlu0 %v1187_v22, %s1237_s7 }
 0x8d7   :  { %v54_v29 = vpop.permute.xlu1 %53 }
 0x8d8   :  { %v111_v30 = vmul.f32 %v1354_v19, %v54_v29  ;;  %v110_v39 = vmul.f32 %v1317_v13, %v54_v29 }
 0x8da   :  { %v148_v33 = vadd.f32 %v1360_v23, %v111_v30  ;;  %v147_v40 = vadd.f32 %v1365_v32, %v110_v39 }
 0x946   :  { %v527_v26 = vpop.permute.xlu0 %526 }
 0x947   :  { %v529_v27 = vmul.f32 %v527_v26, %v512_v25 }
 0x949   :  { %v532_v28 = vpack.c.bf16 %v529_v27, %v529_v27 }
 0x94b   :  { %1139 = vmatmul.mubr.msk.bf16.vlgmr.msra.gmra.mrb[8].mxu0 %vm240_vm0, %v532_v28 }
 0x94c   :  { %681 = vmatpush1.bf16.msra.mxu0 %v1273_v3  ;;  %712 = vmatprep.mubr.bf16.mxu0 %v1236_v2 }
 0x94d   :  { %682 = vmatprep.subr.bf16.mxu0 %v1283_v5 }
 0x950   :  { %683 = vmatpush1.bf16.msra.mxu0 %v1290_v6 }
 0x951   :  { %684 = vmatprep.subr.bf16.mxu0 %v1298_v8 }
 0x954   :  { %685 = vmatpush1.bf16.msra.mxu0 %v1314_v12 }
 0x955   :  { %686 = vmatprep.subr.bf16.mxu0 %v1323_v14 }
 0x958   :  { %687 = vmatpush1.bf16.msra.mxu0 %v1331_v15 }
 0x959   :  { %824 = vmatprep.subr.bf16.mxu0 %v1266_v1 }
 0xa1e   :  { %v570_v31 = vpop.f32.mrb[8].mxu0 }
 0xa1f   :  { %v572_v34 = vpop.f32.mrb[9].mxu0  ;;  %v577_v41 = vadd.f32 %v570_v31, %v147_v40 }
 0xa20   :  { %v578_v35 = vadd.f32 %v572_v34, %v148_v33  ;;  %v574_v36 = vpop.f32.mrb[10].mxu0 }
 0xa21   :  { %v575_v37 = vpop.f32.mrb[11].mxu0 }
 0xa22   :  { %1188 = vtanh.f32 %v578_v35 }
 0xa23   :  { %1190 = vtanh.f32 %v577_v41 }
 0xa2c   :  { %v1189_v38 = vpop.eup %1188 }
 0xa2d   :  { %587 = vrot.lane.b32.xlu0 %v1189_v38, %s1237_s7  ;;  %v1191_v42 = vpop.eup %1190  ;;  %v582_v52 = vmul.f32 0.5, %v1189_v38 }
 0xa2e   :  { %v581_v43 = vmul.f32 0.5, %v1191_v42 }
 0xa2f   :  { %v584_v53 = vadd.f32 0.5, %v582_v52 }
 0xa30   :  { %v583_v44 = vadd.f32 0.5, %v581_v43 }
 0xa32   :  { %v585_v48 = vmul.f32 %v583_v44, %v523_v21  ;;  %v24_v21 = vld [vmem:[%s1579_s0 + $0x30] sm:$0xff] }
 0xa9f   :  { %v588_v45 = vpop.permute.xlu0 %587 }
 0xaa0   :  { %v590_v46 = vmul.f32 %v588_v45, %v583_v44 }
 0xaa2   :  { %592 = vrot.lane.b32.xlu1 %v590_v46, %s1237_s7 }
 0xaa6   :  { %58 = vperm.xlu1 %1151, %v23_v47  }
 0xb14   :  { %v593_v49 = vpop.permute.xlu1 %592 }
 0xb15   :  { %v595_v50 = vadd.f32 %v593_v49, %v585_v48 }
 0xb17   :  { %1192 = vtanh.f32 %v595_v50 }
 0xb21   :  { %v1193_v51 = vpop.eup %1192 }
 0xb22   :  { %598 = vrot.lane.b32.xlu0 %v1193_v51, %s1237_s7 }
 0xb25   :  { %v59_v57 = vpop.permute.xlu1 %58 }
 0xb26   :  { %v113_v58 = vmul.f32 %v1354_v19, %v59_v57  ;;  %v112_v7 = vmul.f32 %v1317_v13, %v59_v57 }
 0xb28   :  { %v150_v60 = vadd.f32 %v1360_v23, %v113_v58  ;;  %v149_v9 = vadd.f32 %v1365_v32, %v112_v7 }
 0xb94   :  { %v599_v54 = vpop.permute.xlu0 %598 }
 0xb95   :  { %v601_v55 = vmul.f32 %v599_v54, %v584_v53 }
 0xb97   :  { %v604_v56 = vpack.c.bf16 %v601_v55, %v601_v55 }
 0xb99   :  { %1140 = vmatmul.mubr.msk.bf16.vlgmr.msra.gmra.mrb[8].mxu1 %vm240_vm0, %v604_v56 }
 0xb9a   :  { %753 = vmatpush1.bf16.msra.mxu1 %v1273_v3  ;;  %784 = vmatprep.mubr.bf16.mxu1 %v1236_v2 }
 0xb9b   :  { %754 = vmatprep.subr.bf16.mxu1 %v1283_v5 }
 0xb9e   :  { %755 = vmatpush1.bf16.msra.mxu1 %v1290_v6 }
 0xb9f   :  { %756 = vmatprep.subr.bf16.mxu1 %v1298_v8 }
 0xba2   :  { %757 = vmatpush1.bf16.msra.mxu1 %v1314_v12 }
 0xba3   :  { %758 = vmatprep.subr.bf16.mxu1 %v1323_v14 }
 0xba6   :  { %759 = vmatpush1.bf16.msra.mxu1 %v1331_v15 }
 0xba7   :  { %896 = vmatprep.subr.bf16.mxu1 %v1266_v1 }
 0xc6c   :  { %v642_v59 = vpop.f32.mrb[8].mxu1 }
 0xc6d   :  { %v644_v61 = vpop.f32.mrb[9].mxu1  ;;  %v649_v10 = vadd.f32 %v642_v59, %v149_v9 }
 0xc6e   :  { %v650_v62 = vadd.f32 %v644_v61, %v150_v60  ;;  %v646_v63 = vpop.f32.mrb[10].mxu1 }
 0xc6f   :  { %v647_v0 = vpop.f32.mrb[11].mxu1 }
 0xc70   :  { %1194 = vtanh.f32 %v650_v62 }
 0xc71   :  { %1196 = vtanh.f32 %v649_v10 }
 0xc7a   :  { %v1195_v4 = vpop.eup %1194 }
 0xc7b   :  { %659 = vrot.lane.b32.xlu0 %v1195_v4, %s1237_s7  ;;  %v1197_v11 = vpop.eup %1196  ;;  %v654_v27 = vmul.f32 0.5, %v1195_v4 }
 0xc7c   :  { %v653_v16 = vmul.f32 0.5, %v1197_v11 }
 0xc7d   :  { %v656_v28 = vadd.f32 0.5, %v654_v27 }
 0xc7e   :  { %v655_v17 = vadd.f32 0.5, %v653_v16 }
 0xc80   :  { %v657_v22 = vmul.f32 %v655_v17, %v595_v50  ;;  %v25_v50 = vld [vmem:[%s1579_s0 + $0x38] sm:$0xff] }
 0xced   :  { %v660_v18 = vpop.permute.xlu0 %659 }
 0xcee   :  { %v662_v20 = vmul.f32 %v660_v18, %v655_v17 }
 0xcf0   :  { %664 = vrot.lane.b32.xlu1 %v662_v20, %s1237_s7 }
 0xcf4   :  { %63 = vperm.xlu1 %1151, %v24_v21  }
 0xd62   :  { %v665_v24 = vpop.permute.xlu1 %664 }
 0xd63   :  { %v667_v25 = vadd.f32 %v665_v24, %v657_v22  ;;  %v26_v24 = vld [vmem:[%s1579_s0 + $0x40] sm:$0xff] }
 0xd65   :  { %1198 = vtanh.f32 %v667_v25 }
 0xd6f   :  { %v1199_v26 = vpop.eup %1198 }
 0xd70   :  { %670 = vrot.lane.b32.xlu0 %v1199_v26, %s1237_s7 }
 0xd73   :  { %v64_v33 = vpop.permute.xlu1 %63 }
 0xd74   :  { %v115_v34 = vmul.f32 %v1354_v19, %v64_v33  ;;  %v114_v42 = vmul.f32 %v1317_v13, %v64_v33 }
 0xd76   :  { %v152_v36 = vadd.f32 %v1360_v23, %v115_v34  ;;  %v151_v43 = vadd.f32 %v1365_v32, %v114_v42 }
 0xde2   :  { %v671_v29 = vpop.permute.xlu0 %670 }
 0xde3   :  { %v673_v30 = vmul.f32 %v671_v29, %v656_v28 }
 0xde5   :  { %v676_v31 = vpack.c.bf16 %v673_v30, %v673_v30 }
 0xde7   :  { %1141 = vmatmul.mubr.msk.bf16.vlgmr.msra.gmra.mrb[12].mxu0 %vm240_vm0, %v676_v31 }
 0xde8   :  { %825 = vmatpush1.bf16.msra.mxu0 %v1273_v3  ;;  %856 = vmatprep.mubr.bf16.mxu0 %v1236_v2 }
 0xde9   :  { %826 = vmatprep.subr.bf16.mxu0 %v1283_v5 }
 0xdec   :  { %827 = vmatpush1.bf16.msra.mxu0 %v1290_v6 }
 0xded   :  { %828 = vmatprep.subr.bf16.mxu0 %v1298_v8 }
 0xdf0   :  { %829 = vmatpush1.bf16.msra.mxu0 %v1314_v12 }
 0xdf1   :  { %830 = vmatprep.subr.bf16.mxu0 %v1323_v14 }
 0xdf4   :  { %831 = vmatpush1.bf16.msra.mxu0 %v1331_v15 }
 0xdf5   :  { %968 = vmatprep.subr.bf16.mxu0 %v1266_v1 }
 0xeba   :  { %v714_v35 = vpop.f32.mrb[12].mxu0 }
 0xebb   :  { %v716_v37 = vpop.f32.mrb[13].mxu0  ;;  %v721_v44 = vadd.f32 %v714_v35, %v151_v43 }
 0xebc   :  { %v722_v38 = vadd.f32 %v716_v37, %v152_v36  ;;  %v718_v39 = vpop.f32.mrb[14].mxu0 }
 0xebd   :  { %v719_v40 = vpop.f32.mrb[15].mxu0 }
 0xebe   :  { %1200 = vtanh.f32 %v722_v38 }
 0xebf   :  { %1202 = vtanh.f32 %v721_v44 }
 0xec8   :  { %v1201_v41 = vpop.eup %1200 }
 0xec9   :  { %731 = vrot.lane.b32.xlu0 %v1201_v41, %s1237_s7  ;;  %v1203_v45 = vpop.eup %1202  ;;  %v726_v55 = vmul.f32 0.5, %v1201_v41 }
 0xeca   :  { %v725_v46 = vmul.f32 0.5, %v1203_v45 }
 0xecb   :  { %v728_v56 = vadd.f32 0.5, %v726_v55 }
 0xecc   :  { %v727_v47 = vadd.f32 0.5, %v725_v46 }
 0xece   :  { %v729_v51 = vmul.f32 %v727_v47, %v667_v25 }
 0xf3b   :  { %v732_v48 = vpop.permute.xlu0 %731 }
 0xf3c   :  { %v734_v49 = vmul.f32 %v732_v48, %v727_v47 }
 0xf3e   :  { %736 = vrot.lane.b32.xlu1 %v734_v49, %s1237_s7 }
 0xf42   :  { %68 = vperm.xlu1 %1151, %v25_v50  }
 0xfb0   :  { %v737_v52 = vpop.permute.xlu1 %736 }
 0xfb1   :  { %v739_v53 = vadd.f32 %v737_v52, %v729_v51  ;;  %v27_v52 = vld [vmem:[%s1579_s0 + $0x48] sm:$0xff] }
 0xfb3   :  { %1204 = vtanh.f32 %v739_v53 }
 0xfbd   :  { %v1205_v54 = vpop.eup %1204 }
 0xfbe   :  { %742 = vrot.lane.b32.xlu0 %v1205_v54, %s1237_s7 }
 0xfc1   :  { %v69_v60 = vpop.permute.xlu1 %68 }
 0xfc2   :  { %v117_v61 = vmul.f32 %v1354_v19, %v69_v60  ;;  %v116_v11 = vmul.f32 %v1317_v13, %v69_v60 }
 0xfc4   :  { %v154_v63 = vadd.f32 %v1360_v23, %v117_v61  ;;  %v153_v16 = vadd.f32 %v1365_v32, %v116_v11 }
0x1030   :  { %v743_v57 = vpop.permute.xlu0 %742 }
0x1031   :  { %v745_v58 = vmul.f32 %v743_v57, %v728_v56 }
0x1033   :  { %v748_v59 = vpack.c.bf16 %v745_v58, %v745_v58 }
0x1035   :  { %1142 = vmatmul.mubr.msk.bf16.vlgmr.msra.gmra.mrb[12].mxu1 %vm240_vm0, %v748_v59 }
0x1036   :  { %897 = vmatpush1.bf16.msra.mxu1 %v1273_v3  ;;  %928 = vmatprep.mubr.bf16.mxu1 %v1236_v2 }
0x1037   :  { %898 = vmatprep.subr.bf16.mxu1 %v1283_v5 }
0x103a   :  { %899 = vmatpush1.bf16.msra.mxu1 %v1290_v6 }
0x103b   :  { %900 = vmatprep.subr.bf16.mxu1 %v1298_v8 }
0x103e   :  { %901 = vmatpush1.bf16.msra.mxu1 %v1314_v12 }
0x103f   :  { %902 = vmatprep.subr.bf16.mxu1 %v1323_v14 }
0x1042   :  { %903 = vmatpush1.bf16.msra.mxu1 %v1331_v15 }
0x1043   :  { %1040 = vmatprep.subr.bf16.mxu1 %v1266_v1 }
0x1108   :  { %v786_v62 = vpop.f32.mrb[12].mxu1 }
0x1109   :  { %v788_v0 = vpop.f32.mrb[13].mxu1  ;;  %v793_v17 = vadd.f32 %v786_v62, %v153_v16 }
0x110a   :  { %v794_v4 = vadd.f32 %v788_v0, %v154_v63  ;;  %v790_v7 = vpop.f32.mrb[14].mxu1 }
0x110b   :  { %v791_v9 = vpop.f32.mrb[15].mxu1 }
0x110c   :  { %1206 = vtanh.f32 %v794_v4 }
0x110d   :  { %1208 = vtanh.f32 %v793_v17  ;;  %v28_v17 = vld [vmem:[%s1579_s0 + $0x50] sm:$0xff] }
0x1116   :  { %v1207_v10 = vpop.eup %1206 }
0x1117   :  { %803 = vrot.lane.b32.xlu0 %v1207_v10, %s1237_s7  ;;  %v1209_v1 = vpop.eup %1208  ;;  %v798_v29 = vmul.f32 0.5, %v1207_v10 }
0x1118   :  { %v797_v18 = vmul.f32 0.5, %v1209_v1 }
0x1119   :  { %v800_v30 = vadd.f32 0.5, %v798_v29 }
0x111a   :  { %v799_v20 = vadd.f32 0.5, %v797_v18 }
0x111c   :  { %v801_v25 = vmul.f32 %v799_v20, %v739_v53 }
0x1189   :  { %v804_v21 = vpop.permute.xlu0 %803 }
0x118a   :  { %v806_v22 = vmul.f32 %v804_v21, %v799_v20 }
0x118c   :  { %808 = vrot.lane.b32.xlu1 %v806_v22, %s1237_s7 }
0x1190   :  { %73 = vperm.xlu1 %1151, %v26_v24  }
0x11fe   :  { %v809_v26 = vpop.permute.xlu1 %808 }
0x11ff   :  { %v811_v27 = vadd.f32 %v809_v26, %v801_v25 }
0x1201   :  { %1210 = vtanh.f32 %v811_v27 }
0x120b   :  { %v1211_v28 = vpop.eup %1210 }
0x120c   :  { %814 = vrot.lane.b32.xlu0 %v1211_v28, %s1237_s7 }
0x120f   :  { %v74_v35 = vpop.permute.xlu1 %73 }
0x1210   :  { %v119_v36 = vmul.f32 %v1354_v19, %v74_v35  ;;  %v118_v44 = vmul.f32 %v1317_v13, %v74_v35 }
0x1212   :  { %v156_v38 = vadd.f32 %v1360_v23, %v119_v36  ;;  %v155_v45 = vadd.f32 %v1365_v32, %v118_v44 }
0x127e   :  { %v815_v31 = vpop.permute.xlu0 %814 }
0x127f   :  { %v817_v33 = vmul.f32 %v815_v31, %v800_v30 }
0x1281   :  { %v820_v34 = vpack.c.bf16 %v817_v33, %v817_v33 }
0x1283   :  { %1143 = vmatmul.mubr.msk.bf16.vlgmr.msra.gmra.mrb[16].mxu0 %vm240_vm0, %v820_v34 }
0x1284   :  { %969 = vmatpush1.bf16.msra.mxu0 %v1273_v3  ;;  %1000 = vmatprep.mubr.bf16.mxu0 %v1236_v2 }
0x1285   :  { %970 = vmatprep.subr.bf16.mxu0 %v1283_v5 }
0x1288   :  { %971 = vmatpush1.bf16.msra.mxu0 %v1290_v6 }
0x1289   :  { %972 = vmatprep.subr.bf16.mxu0 %v1298_v8 }
0x128c   :  { %973 = vmatpush1.bf16.msra.mxu0 %v1314_v12 }
0x128d   :  { %974 = vmatprep.subr.bf16.mxu0 %v1323_v14 }
0x1290   :  { %975 = vmatpush1.bf16.msra.mxu0 %v1331_v15 }
0x1356   :  { %v858_v37 = vpop.f32.mrb[16].mxu0 }
0x1357   :  { %v860_v39 = vpop.f32.mrb[17].mxu0  ;;  %v865_v46 = vadd.f32 %v858_v37, %v155_v45 }
0x1358   :  { %v866_v40 = vadd.f32 %v860_v39, %v156_v38  ;;  %v862_v41 = vpop.f32.mrb[18].mxu0 }
0x1359   :  { %v863_v42 = vpop.f32.mrb[19].mxu0 }
0x135a   :  { %1212 = vtanh.f32 %v866_v40 }
0x135b   :  { %1214 = vtanh.f32 %v865_v46  ;;  %v29_v46 = vld [vmem:[%s1579_s0 + $0x58] sm:$0xff] }
0x1364   :  { %v1213_v43 = vpop.eup %1212 }
0x1365   :  { %875 = vrot.lane.b32.xlu0 %v1213_v43, %s1237_s7  ;;  %v1215_v47 = vpop.eup %1214  ;;  %v870_v57 = vmul.f32 0.5, %v1213_v43 }
0x1366   :  { %v869_v48 = vmul.f32 0.5, %v1215_v47 }
0x1367   :  { %v872_v58 = vadd.f32 0.5, %v870_v57 }
0x1368   :  { %v871_v49 = vadd.f32 0.5, %v869_v48 }
0x136a   :  { %v873_v53 = vmul.f32 %v871_v49, %v811_v27 }
0x13d7   :  { %v876_v50 = vpop.permute.xlu0 %875 }
0x13d8   :  { %v878_v51 = vmul.f32 %v876_v50, %v871_v49 }
0x13da   :  { %880 = vrot.lane.b32.xlu1 %v878_v51, %s1237_s7 }
0x13de   :  { %78 = vperm.xlu1 %1151, %v27_v52  }
0x144c   :  { %v881_v54 = vpop.permute.xlu1 %880 }
0x144d   :  { %v883_v55 = vadd.f32 %v881_v54, %v873_v53 }
0x144f   :  { %1216 = vtanh.f32 %v883_v55 }
0x1459   :  { %v1217_v56 = vpop.eup %1216 }
0x145a   :  { %886 = vrot.lane.b32.xlu0 %v1217_v56, %s1237_s7 }
0x145d   :  { %v79_v62 = vpop.permute.xlu1 %78 }
0x145e   :  { %v121_v63 = vmul.f32 %v1354_v19, %v79_v62 }
0x14cc   :  { %v887_v59 = vpop.permute.xlu0 %886 }
0x14cd   :  { %v889_v60 = vmul.f32 %v887_v59, %v872_v58 }
0x14cf   :  { %v892_v61 = vpack.c.bf16 %v889_v60, %v889_v60 }
0x14d1   :  { %1144 = vmatmul.mubr.msk.bf16.vlgmr.msra.gmra.mrb[16].mxu1 %vm240_vm0, %v892_v61 }
0x14d2   :  { %1041 = vmatpush1.bf16.msra.mxu1 %v1273_v3  ;;  %1072 = vmatprep.mubr.bf16.mxu1 %v1236_v2  ;;  %v158_v3 = vadd.f32 %v1360_v23, %v121_v63 }
0x14d3   :  { %1042 = vmatprep.subr.bf16.mxu1 %v1283_v5 }
0x14d6   :  { %1043 = vmatpush1.bf16.msra.mxu1 %v1290_v6 }
0x14d7   :  { %1044 = vmatprep.subr.bf16.mxu1 %v1298_v8  ;;  %v120_v8 = vmul.f32 %v1317_v13, %v79_v62 }
0x14da   :  { %1045 = vmatpush1.bf16.msra.mxu1 %v1314_v12  ;;  %v157_v12 = vadd.f32 %v1365_v32, %v120_v8 }
0x14db   :  { %1046 = vmatprep.subr.bf16.mxu1 %v1323_v14 }
0x14de   :  { %1047 = vmatpush1.bf16.msra.mxu1 %v1331_v15 }
0x15a4   :  { %v930_v0 = vpop.f32.mrb[16].mxu1 }
0x15a5   :  { %v932_v4 = vpop.f32.mrb[17].mxu1  ;;  %v937_v14 = vadd.f32 %v930_v0, %v157_v12 }
0x15a6   :  { %v938_v2 = vadd.f32 %v932_v4, %v158_v3  ;;  %v934_v7 = vpop.f32.mrb[18].mxu1 }
0x15a7   :  { %v935_v5 = vpop.f32.mrb[19].mxu1 }
0x15a8   :  { %1218 = vtanh.f32 %v938_v2 }
0x15a9   :  { %1220 = vtanh.f32 %v937_v14 }
0x15b2   :  { %v1219_v6 = vpop.eup %1218 }
0x15b3   :  { %947 = vrot.lane.b32.xlu0 %v1219_v6, %s1237_s7  ;;  %v1221_v15 = vpop.eup %1220  ;;  %v942_v22 = vmul.f32 0.5, %v1219_v6 }
0x15b4   :  { %v941_v9 = vmul.f32 0.5, %v1221_v15 }
0x15b5   :  { %v944_v24 = vadd.f32 0.5, %v942_v22 }
0x15b6   :  { %v943_v10 = vadd.f32 0.5, %v941_v9 }
0x15b8   :  { %v945_v1 = vmul.f32 %v943_v10, %v883_v55 }
0x1625   :  { %v948_v11 = vpop.permute.xlu0 %947 }
0x1626   :  { %v950_v16 = vmul.f32 %v948_v11, %v943_v10 }
0x1628   :  { %952 = vrot.lane.b32.xlu1 %v950_v16, %s1237_s7 }
0x162c   :  { %83 = vperm.xlu1 %1151, %v28_v17  }
0x169a   :  { %v953_v18 = vpop.permute.xlu1 %952 }
0x169b   :  { %v955_v20 = vadd.f32 %v953_v18, %v945_v1 }
0x169d   :  { %1222 = vtanh.f32 %v955_v20 }
0x16a7   :  { %v1223_v21 = vpop.eup %1222 }
0x16a8   :  { %958 = vrot.lane.b32.xlu0 %v1223_v21, %s1237_s7 }
0x16ab   :  { %v84_v28 = vpop.permute.xlu1 %83 }
0x16ac   :  { %v123_v29 = vmul.f32 %v1354_v19, %v84_v28  ;;  %v122_v38 = vmul.f32 %v1317_v13, %v84_v28 }
0x16ae   :  { %v160_v31 = vadd.f32 %v1360_v23, %v123_v29  ;;  %v159_v39 = vadd.f32 %v1365_v32, %v122_v38 }
0x171a   :  { %v959_v25 = vpop.permute.xlu0 %958 }
0x171b   :  { %v961_v26 = vmul.f32 %v959_v25, %v944_v24 }
0x171d   :  { %v964_v27 = vpack.c.bf16 %v961_v26, %v961_v26 }
0x171f   :  { %1145 = vmatmul.mubr.msk.bf16.vlgmr.msra.gmra.mrb[20].mxu0 %vm240_vm0, %v964_v27 }
0x17f2   :  { %v1002_v30 = vpop.f32.mrb[20].mxu0 }
0x17f3   :  { %v1004_v33 = vpop.f32.mrb[21].mxu0  ;;  %v1009_v40 = vadd.f32 %v1002_v30, %v159_v39 }
0x17f4   :  { %v1010_v34 = vadd.f32 %v1004_v33, %v160_v31  ;;  %v1006_v35 = vpop.f32.mrb[22].mxu0 }
0x17f5   :  { %v1007_v36 = vpop.f32.mrb[23].mxu0 }
0x17f6   :  { %1224 = vtanh.f32 %v1010_v34 }
0x17f7   :  { %1226 = vtanh.f32 %v1009_v40 }
0x1800   :  { %v1225_v37 = vpop.eup %1224 }
0x1801   :  { %1019 = vrot.lane.b32.xlu0 %v1225_v37, %s1237_s7  ;;  %v1227_v41 = vpop.eup %1226  ;;  %v1014_v51 = vmul.f32 0.5, %v1225_v37 }
0x1802   :  { %v1013_v42 = vmul.f32 0.5, %v1227_v41 }
0x1803   :  { %v1016_v52 = vadd.f32 0.5, %v1014_v51 }
0x1804   :  { %v1015_v43 = vadd.f32 0.5, %v1013_v42 }
0x1806   :  { %v1017_v47 = vmul.f32 %v1015_v43, %v955_v20 }
0x1873   :  { %v1020_v44 = vpop.permute.xlu0 %1019 }
0x1874   :  { %v1022_v45 = vmul.f32 %v1020_v44, %v1015_v43 }
0x1876   :  { %1024 = vrot.lane.b32.xlu1 %v1022_v45, %s1237_s7 }
0x187a   :  { %88 = vperm.xlu1 %1151, %v29_v46  }
0x18e8   :  { %v1025_v48 = vpop.permute.xlu1 %1024 }
0x18e9   :  { %v1027_v49 = vadd.f32 %v1025_v48, %v1017_v47 }
0x18eb   :  { %1228 = vtanh.f32 %v1027_v49 }
0x18f5   :  { %v1229_v50 = vpop.eup %1228 }
0x18f6   :  { %1030 = vrot.lane.b32.xlu0 %v1229_v50, %s1237_s7 }
0x18f9   :  { %v89_v56 = vpop.permute.xlu1 %88 }
0x18fa   :  { %v125_v57 = vmul.f32 %v1354_v19, %v89_v56  ;;  %v124_v3 = vmul.f32 %v1317_v13, %v89_v56 }
0x18fc   :  { %v162_v59 = vadd.f32 %v1360_v23, %v125_v57  ;;  %v161_v4 = vadd.f32 %v1365_v32, %v124_v3  ;;  %v1147_v32 = vld [vmem:[%s1580_s3 + $0x2] ss:$0 sm:$0xff] }
0x1968   :  { %v1031_v53 = vpop.permute.xlu0 %1030 }
0x1969   :  { %v1033_v54 = vmul.f32 %v1031_v53, %v1016_v52 }
0x196b   :  { %v1036_v55 = vpack.c.bf16 %v1033_v54, %v1033_v54 }
0x196d   :  { %1146 = vmatmul.mubr.msk.bf16.vlgmr.msra.gmra.mrb[20].mxu1 %vm240_vm0, %v1036_v55 }
0x1a40   :  { %v1074_v58 = vpop.f32.mrb[20].mxu1 }
0x1a41   :  { %v1076_v60 = vpop.f32.mrb[21].mxu1  ;;  %v1081_v2 = vadd.f32 %v1074_v58, %v161_v4 }
0x1a42   :  { %v1082_v61 = vadd.f32 %v1076_v60, %v162_v59  ;;  %v1078_v62 = vpop.f32.mrb[22].mxu1 }
0x1a43   :  { %v1079_v63 = vpop.f32.mrb[23].mxu1 }
0x1a44   :  { %1230 = vtanh.f32 %v1082_v61 }
0x1a45   :  { %1232 = vtanh.f32 %v1081_v2 }
0x1a4e   :  { %v1231_v0 = vpop.eup %1230 }
0x1a4f   :  { %1091 = vrot.lane.b32.xlu0 %v1231_v0, %s1237_s7  ;;  %v1233_v7 = vpop.eup %1232  ;;  %v1086_v9 = vmul.f32 0.5, %v1231_v0 }
0x1a50   :  { %v1085_v5 = vmul.f32 0.5, %v1233_v7 }
0x1a51   :  { %v1088_v13 = vadd.f32 0.5, %v1086_v9 }
0x1a52   :  { %v1087_v19 = vadd.f32 0.5, %v1085_v5 }
0x1a54   :  { %v1089_v23 = vmul.f32 %v1087_v19, %v1027_v49 }
0x1ac1   :  { %v1092_v6 = vpop.permute.xlu0 %1091 }
0x1ac2   :  { %v1094_v8 = vmul.f32 %v1092_v6, %v1087_v19 }
0x1ac4   :  { %1096 = vrot.lane.b32.xlu1 %v1094_v8, %s1237_s7 }
0x1b36   :  { %v1097_v12 = vpop.permute.xlu1 %1096 }
0x1b37   :  { %v1099_v14 = vadd.f32 %v1097_v12, %v1089_v23 }
0x1b39   :  { %1234 = vtanh.f32 %v1099_v14 }
0x1b43   :  { %v1235_v15 = vpop.eup %1234 }
0x1b44   :  { %1102 = vrot.lane.b32.xlu0 %v1235_v15, %s1237_s7 }
0x1bb6   :  { %v1103_v10 = vpop.permute.xlu0 %1102 }
0x1bb7   :  { %v1105_v11 = vmul.f32 %v1103_v10, %v1088_v13 }
0x1bb9   :  { %v1111_v16 = vmul.f32 %v1147_v32, %v1105_v11 }
0x1bbb   :  { %v1112_v17 = vsel %vm240_vm0, %v1111_v16, 0.0 }
0x1bbc   :  { %1113 = vadd.xlane.f32.xlu1 %v1112_v17 }
0x1c49   :  { %v1114_v1 = vpop.xlane.xlu1 %1113 }
0x1c4a   :  { %v1115_v18 = vadd.f32 %v1147_v32, %v1114_v1 }
0x1c4c   :  { %1117 = vrot.lane.b32.xlu0 %v1115_v18, %s1237_s7 }
0x1cbe   :  { %v1118_v20 = vpop.permute.xlu0 %1117 }
0x1cbf   :  { %1121 = vst.msk [vmem:[%s1582_s4] sm:$0xff] %vm1120_vm1, %v1118_v20 }

</bundles_post_ra>
